<compile_context>
chip_gen: v5e
topology: v5e:2x2
jax: 0.10.0
libtpu: 0.0.40
codegen_flags: <defaults>
</compile_context>

<pallas_src>
import jax
import jax.numpy as jnp
import numpy as np
from jax.experimental import pallas as pl
from jax.experimental.pallas import tpu as pltpu


def _round_up(x, m):
    return ((x + m - 1) // m) * m


def _reduce_1p_0p_kernel(rstart_ref, seg_ref, x_ref, w_ref, b_ref, o_ref, acc_ref):
    """Fused linmaps0 (segment-sum over a bounded R-window) + Linear.

    grid = (N_tiles, kr); axis 1 walks the per-N-tile window of R-tiles.
      rstart_ref : SMEM [N_tiles] int32   window-start R-tile per N-tile
                   (consumed by the index_maps only)
      seg_ref    : [1,  tr] int32  row -> domain ids (-1 for padded rows)
      x_ref      : [tr, Kp] f32    ptensors1 feature rows
      w_ref      : [Kp, Cp] f32    Linear weight (grid-invariant resident)
      b_ref      : [1,  Cp] f32    Linear bias   (grid-invariant resident)
      o_ref      : [tn, Cp] f32    ptensors0 output features
      acc_ref    : VMEM [tn, Kp] f32 segment-sum accumulator
    """
    del rstart_ref  # used only by the index_maps
    i = pl.program_id(0)
    k = pl.program_id(1)
    tn = acc_ref.shape[0]
    tr = x_ref.shape[0]

    @pl.when(k == 0)
    def _init():
        acc_ref[...] = jnp.zeros_like(acc_ref)

    # Build the [tn, tr] one-hot segment tile on the VPU (int32 compare, cast
    # at the end -> also safe on v5e which lacks a bf16 VALU path).
    dom = jax.lax.broadcasted_iota(jnp.int32, (tn, tr), 0) + i * tn
    one_hot = (dom == seg_ref[...]).astype(jnp.float32)          # [tn, tr]

    # linmaps0 partial reduction: exact 0/1 segment-sum on the MXU, f32 acc.
    acc_ref[...] += jnp.dot(one_hot, x_ref[...],
                            preferred_element_type=jnp.float32)

    @pl.when(k == pl.num_programs(1) - 1)
    def _epilogue():
        # Linear: (per-domain summed features) @ W + b, once per N-tile, f32.
        out = jnp.dot(acc_ref[...], w_ref[...],
                      preferred_element_type=jnp.float32)
        o_ref[...] = (out + b_ref[...]).astype(o_ref.dtype)


def reduce_1p_0p(sizes, X, W, b, *, tn=256, tr=512,
                 vmem_limit_bytes=48 * 1024 * 1024):
    """Reduce_1P_0P forward: out[d] = (sum_{r in domain d} X[r]) @ W + b.

    `sizes` is the (host-side) ptensors1 structure: number of atoms per
    reference domain; domain d owns the contiguous row slice of X given by
    the running offsets of `sizes`.
    """
    sizes = np.asarray(sizes, dtype=np.int64)
    N = int(sizes.size)
    R = int(sizes.sum())
    R_x, K = X.shape
    K2, C = W.shape
    assert R == R_x and K == K2 and b.shape == (C,)
    assert R > 0 and N > 0

    # ---- tile geometry (8 / 128 aligned, clamped to the problem) ----------
    tn = max(8, min(int(tn), _round_up(N, 8)))
    tn = _round_up(tn, 8)
    tr = max(128, min(int(tr), _round_up(R, 128)))
    tr = _round_up(tr, 128)

    Np, Rp = _round_up(N, tn), _round_up(R, tr)
    Kp, Cp = _round_up(K, 128), _round_up(C, 128)
    n_ntiles, n_rtiles = Np // tn, Rp // tr

    # ---- host-side structural metadata (ptensors1 atom bookkeeping) -------
    offsets = np.zeros(N + 1, dtype=np.int64)
    offsets[1:] = np.cumsum(sizes)

    # row -> domain segment ids, built directly at padded length (sentinel -1
    # for padded rows: never matches a domain id, so padding contributes 0).
    seg_np = np.full((1, Rp), -1, dtype=np.int32)
    seg_np[0, :R] = np.repeat(np.arange(N, dtype=np.int32), sizes)

    # Per-N-tile bounded reduction window over R-tiles.
    dom_lo = np.arange(n_ntiles, dtype=np.int64) * tn
    dom_hi = np.minimum(dom_lo + tn, N)
    row_lo, row_hi = offsets[dom_lo], offsets[dom_hi]
    first = row_lo // tr
    last = np.where(row_hi > row_lo, (row_hi - 1) // tr, first)
    kr = max(int(np.max(last - first + 1)), 1)          # window length (tiles)
    # Shift each window left so it stays inside [0, n_rtiles): extra tiles on
    # the left belong to earlier domains and are masked to zero by the
    # one-hot, and no tile is ever visited twice for a given N-tile.
    rstart_np = np.minimum(first, n_rtiles - kr).astype(np.int32)

    # ---- padded device operands (single copy, lane-dense) -----------------
    X = jnp.asarray(X, jnp.float32)
    if (Rp, Kp) != (R, K):
        X_p = jnp.zeros((Rp, Kp), jnp.float32).at[:R, :K].set(X)
    else:
        X_p = X
    W_f = jnp.asarray(W, jnp.float32)
    if (Kp, Cp) != (K, C):
        W_p = jnp.zeros((Kp, Cp), jnp.float32).at[:K, :C].set(W_f)
    else:
        W_p = W_f
    b_p = jnp.zeros((1, Cp), jnp.float32).at[0, :C].set(jnp.asarray(b, jnp.float32))
    seg = jnp.asarray(seg_np)
    rstart = jnp.asarray(rstart_np)

    grid = (n_ntiles, kr)

    out = pl.pallas_call(
        _reduce_1p_0p_kernel,
        out_shape=jax.ShapeDtypeStruct((Np, Cp), jnp.float32),
        grid_spec=pltpu.PrefetchScalarGridSpec(
            num_scalar_prefetch=1,            # rstart -> SMEM, feeds index_maps
            grid=grid,
            in_specs=[
                # segment ids for the current R-tile of this N-tile's window
                pl.BlockSpec((1, tr), lambda i, k, rs: (0, rs[i] + k)),
                # ptensors1 feature rows for the same R-tile
                pl.BlockSpec((tr, Kp), lambda i, k, rs: (rs[i] + k, 0)),
                # Linear weight / bias: grid-invariant residents
                pl.BlockSpec((Kp, Cp), lambda i, k, rs: (0, 0)),
                pl.BlockSpec((1, Cp), lambda i, k, rs: (0, 0)),
            ],
            out_specs=pl.BlockSpec((tn, Cp), lambda i, k, rs: (i, 0)),
            scratch_shapes=[pltpu.VMEM((tn, Kp), jnp.float32)],
        ),
        compiler_params=pltpu.CompilerParams(
            dimension_semantics=("parallel", "arbitrary"),
            vmem_limit_bytes=vmem_limit_bytes,   # <= v7x's 64 MiB VMEM
        ),
    )(rstart, seg, X_p, W_p, b_p)

    return out[:N, :C]


def _reference(sizes, X, W, b):
    """Plain f32 reference matching the PyTorch module (linmaps0 + Linear)."""
    sizes = np.asarray(sizes, dtype=np.int64)
    N, R = int(sizes.size), int(sizes.sum())
    seg = np.repeat(np.arange(N), sizes)
    A = np.zeros((N, R), np.float32)
    A[seg, np.arange(R)] = 1.0
    return (A @ np.asarray(X, np.float32)) @ np.asarray(W, np.float32) \
        + np.asarray(b, np.float32)[None, :]


if __name__ == "__main__":
    key = jax.random.PRNGKey(0)
    in_channels, out_channels = 32, 16

    def run_case(num_domains, case_id):
        k_x, k_w = jax.random.split(jax.random.fold_in(key, case_id))
        # ptensors1 structure: domains with 1..5 atoms each (contiguous rows).
        base = np.array([1, 2, 3, 4, 5, 3], dtype=np.int64)
        sizes = np.tile(base, (num_domains + len(base) - 1) // len(base))[:num_domains]
        total_rows = int(sizes.sum())

        X = jax.random.normal(k_x, (total_rows, in_channels), dtype=jnp.float32)
        # xavier_uniform weight, zero bias (matches Linear.reset_parameters).
        limit = float(np.sqrt(6.0 / (in_channels + out_channels)))
        W = jax.random.uniform(k_w, (in_channels, out_channels),
                               dtype=jnp.float32, minval=-limit, maxval=limit)
        b = jnp.zeros((out_channels,), dtype=jnp.float32)

        out = jax.block_until_ready(reduce_1p_0p(sizes, X, W, b))
        ref = _reference(sizes, X, W, b)
        np.testing.assert_allclose(np.asarray(out), ref, rtol=2e-2, atol=2e-2)

    # Case 1: small shapes (48 domains, 144 rows) -> single-tile grid.
    run_case(48, 0)
    # Case 2: 512 domains (~1.5K rows) -> 2 "parallel" N-tiles (even count for
    # v7x megacore) x bounded 2-tile R-windows; exercises the scalar-prefetched
    # window offsets, the in-kernel one-hot and the sentinel-padded rows.
    run_case(512, 1)

    print("KERNEL_OK")
</pallas_src>

<mosaic_0001>
module attributes {stable_mosaic.version = 11 : i64} {
  func.func @_reduce_1p_0p_kernel(%arg0: i32, %arg1: i32, %arg2: memref<1xi32, #tpu.memory_space<smem>>, %arg3: memref<1x256xi32, #tpu.memory_space<vmem>>, %arg4: memref<256x128xf32, #tpu.memory_space<vmem>>, %arg5: memref<128x128xf32, #tpu.memory_space<vmem>>, %arg6: memref<1x128xf32, #tpu.memory_space<vmem>>, %arg7: memref<48x128xf32, #tpu.memory_space<vmem>>, %arg8: memref<48x128xf32, #tpu.memory_space<vmem>>) attributes {dimension_semantics = [#tpu.dimension_semantics<parallel>, #tpu.dimension_semantics<arbitrary>], iteration_bounds = array<i64: 1, 1>, scalar_prefetch = 1 : i64, scratch_operands = 1 : i64, tpu.core_type = #tpu.core_type<tc>, window_params = [{transform_indices = @transform_0, window_bounds = array<i64: 1, 256>}, {transform_indices = @transform_1, window_bounds = array<i64: 256, 128>}, {pipeline_mode = #tpu.pipeline_mode<synchronous>, transform_indices = @transform_2, window_bounds = array<i64: 128, 128>}, {pipeline_mode = #tpu.pipeline_mode<synchronous>, transform_indices = @transform_3, window_bounds = array<i64: 1, 128>}, {transform_indices = @transform_4, window_bounds = array<i64: 48, 128>}]} {
    %c0_i32 = arith.constant 0 : i32
    %0 = arith.cmpi eq, %arg1, %c0_i32 : i32
    %1 = arith.extui %0 : i1 to i32
    %c0_i32_0 = arith.constant 0 : i32
    %2 = arith.cmpi ne, %1, %c0_i32_0 : i32
    scf.if %2 {
      %cst_10 = arith.constant 0.000000e+00 : f32
      %20 = vector.broadcast %cst_10 : f32 to vector<48x128xf32>
      %c0_11 = arith.constant 0 : index
      %c0_12 = arith.constant 0 : index
      %21 = vector.load %arg8[%c0_11, %c0_12] : memref<48x128xf32, #tpu.memory_space<vmem>>, vector<48x128xf32>
      tpu.vector_store %arg8[%c0_11, %c0_12], %20 {strides = array<i32>} : memref<48x128xf32, #tpu.memory_space<vmem>>, vector<48x128xf32>,
    } else {
    }
    %3 = tpu.iota {dimensions = array<i32: 0>} : vector<48x256xi32>
    %c48_i32 = arith.constant 48 : i32
    %4 = arith.muli %arg0, %c48_i32 : i32
    %5 = vector.broadcast %4 : i32 to vector<48x256xi32>
    %6 = arith.addi %3, %5 : vector<48x256xi32>
    %c0 = arith.constant 0 : index
    %c0_1 = arith.constant 0 : index
    %7 = vector.load %arg3[%c0, %c0_1] : memref<1x256xi32, #tpu.memory_space<vmem>>, vector<1x256xi32>
    %8 = vector.broadcast %7 : vector<1x256xi32> to vector<48x256xi32>
    %9 = arith.cmpi eq, %6, %8 : vector<48x256xi32>
    %10 = arith.extui %9 : vector<48x256xi1> to vector<48x256xi32>
    %11 = arith.sitofp %10 : vector<48x256xi32> to vector<48x256xf32>
    %c0_2 = arith.constant 0 : index
    %c0_3 = arith.constant 0 : index
    %12 = vector.load %arg8[%c0_2, %c0_3] : memref<48x128xf32, #tpu.memory_space<vmem>>, vector<48x128xf32>
    %c0_4 = arith.constant 0 : index
    %c0_5 = arith.constant 0 : index
    %13 = vector.load %arg4[%c0_4, %c0_5] : memref<256x128xf32, #tpu.memory_space<vmem>>, vector<256x128xf32>
    %cst = arith.constant dense<0.000000e+00> : vector<48x128xf32>
    %14 = tpu.matmul %11, %13, %cst {dimension_numbers = #tpu.dot_dimension_numbers<[1], [0], [0], [1], [0, 0, 1, 1], [], []>} : vector<48x256xf32>, vector<256x128xf32>, vector<48x128xf32> -> vector<48x128xf32>
    %15 = arith.addf %12, %14 : vector<48x128xf32>
    %c0_6 = arith.constant 0 : index
    %c0_7 = arith.constant 0 : index
    %16 = vector.load %arg8[%c0_6, %c0_7] : memref<48x128xf32, #tpu.memory_space<vmem>>, vector<48x128xf32>
    tpu.vector_store %arg8[%c0_6, %c0_7], %15 {strides = array<i32>} : memref<48x128xf32, #tpu.memory_space<vmem>>, vector<48x128xf32>,
    %c0_i32_8 = arith.constant 0 : i32
    %17 = arith.cmpi eq, %arg1, %c0_i32_8 : i32
    %18 = arith.extui %17 : i1 to i32
    %c0_i32_9 = arith.constant 0 : i32
    %19 = arith.cmpi ne, %18, %c0_i32_9 : i32
    scf.if %19 {
      %c0_10 = arith.constant 0 : index
      %c0_11 = arith.constant 0 : index
      %20 = vector.load %arg8[%c0_10, %c0_11] : memref<48x128xf32, #tpu.memory_space<vmem>>, vector<48x128xf32>
      %c0_12 = arith.constant 0 : index
      %c0_13 = arith.constant 0 : index
      %21 = vector.load %arg5[%c0_12, %c0_13] : memref<128x128xf32, #tpu.memory_space<vmem>>, vector<128x128xf32>
      %cst_14 = arith.constant dense<0.000000e+00> : vector<48x128xf32>
      %22 = tpu.matmul %20, %21, %cst_14 {dimension_numbers = #tpu.dot_dimension_numbers<[1], [0], [0], [1], [0, 0, 1, 1], [], []>} : vector<48x128xf32>, vector<128x128xf32>, vector<48x128xf32> -> vector<48x128xf32>
      %c0_15 = arith.constant 0 : index
      %c0_16 = arith.constant 0 : index
      %23 = vector.load %arg6[%c0_15, %c0_16] : memref<1x128xf32, #tpu.memory_space<vmem>>, vector<1x128xf32>
      %24 = vector.broadcast %23 : vector<1x128xf32> to vector<48x128xf32>
      %25 = arith.addf %22, %24 : vector<48x128xf32>
      %c0_17 = arith.constant 0 : index
      %c0_18 = arith.constant 0 : index
      %26 = vector.load %arg7[%c0_17, %c0_18] : memref<48x128xf32, #tpu.memory_space<vmem>>, vector<48x128xf32>
      tpu.vector_store %arg7[%c0_17, %c0_18], %25 {strides = array<i32>} : memref<48x128xf32, #tpu.memory_space<vmem>>, vector<48x128xf32>,
    } else {
    }
    return
  }
  func.func @transform_0(%arg0: i32, %arg1: i32, %arg2: memref<1xi32, #tpu.memory_space<smem>>) -> (i32, i32) {
    %0 = arith.index_cast %arg0 : i32 to index
    %1 = memref.load %arg2[%0] : memref<1xi32, #tpu.memory_space<smem>>
    %2 = arith.addi %1, %arg1 : i32
    %c0_i32 = arith.constant 0 : i32
    %c0_i32_0 = arith.constant 0 : i32
    return %c0_i32, %2 : i32, i32
  }
  func.func @transform_1(%arg0: i32, %arg1: i32, %arg2: memref<1xi32, #tpu.memory_space<smem>>) -> (i32, i32) {
    %0 = arith.index_cast %arg0 : i32 to index
    %1 = memref.load %arg2[%0] : memref<1xi32, #tpu.memory_space<smem>>
    %2 = arith.addi %1, %arg1 : i32
    %c0_i32 = arith.constant 0 : i32
    %c0_i32_0 = arith.constant 0 : i32
    return %2, %c0_i32 : i32, i32
  }
  func.func @transform_2(%arg0: i32, %arg1: i32, %arg2: memref<1xi32, #tpu.memory_space<smem>>) -> (i32, i32) {
    %c0_i32 = arith.constant 0 : i32
    %c0_i32_0 = arith.constant 0 : i32
    %c0_i32_1 = arith.constant 0 : i32
    return %c0_i32, %c0_i32_0 : i32, i32
  }
  func.func @transform_3(%arg0: i32, %arg1: i32, %arg2: memref<1xi32, #tpu.memory_space<smem>>) -> (i32, i32) {
    %c0_i32 = arith.constant 0 : i32
    %c0_i32_0 = arith.constant 0 : i32
    %c0_i32_1 = arith.constant 0 : i32
    return %c0_i32, %c0_i32_0 : i32, i32
  }
  func.func @transform_4(%arg0: i32, %arg1: i32, %arg2: memref<1xi32, #tpu.memory_space<smem>>) -> (i32, i32) {
    %c0_i32 = arith.constant 0 : i32
    %c0_i32_0 = arith.constant 0 : i32
    return %arg0, %c0_i32 : i32, i32
  }
}

</mosaic_0001>

<bundles_post_ra>
// kernel: tpu_custom_call.1
= control target key start
LH: loop header
LB: loop body
LE: loop exit
PB: predicated region body
PF: predicated region fallthrough
CT: control target
= control target key end

     0   :  { %11 = vsyncpa [#allocation6], 0  ;;  %s589_s0 = inlined_call_operand.<no memory space> [shape: s32[1], index: 0, kind: input, shape index: {}]   ;;  %s590_s1 = inlined_call_operand.vmem [shape: s32[1,256], index: 1, kind: input, shape index: {}]   ;;  %s591_s2 = inlined_call_operand.hbm [shape: f32[256,128], index: 2, kind: input, shape index: {}]   ;;  %s592_s3 = inlined_call_operand.hbm [shape: f32[128,128], index: 3, kind: input, shape index: {}]   ;;  %s593_s4 = inlined_call_operand.vmem [shape: f32[1,128], index: 4, kind: input, shape index: {}]   ;;  %s594_s5 = inlined_call_operand.hbm [shape: f32[48,128], index: 5, kind: output, shape index: {}]  }
   0x1   :  { %12 = vsyncpa [#allocation9], 0 }
   0x2   :  { %13 = vsyncpa [#allocation7], 0  ;;  %s390_s20 = sshll.u32 %s589_s0, 8  ;;  %s492_s24 = smov [#allocation5]  }
   0x3   :  { %s33_s23 = scalar_lea.hbm %s591_s2, %s390_s20  ;;  %s36_s25 = sshll.u32 %s492_s24, 4  ;;  %s37_s25 = int_to_ptr.vmem [resolvable:$true] %s36_s25 }
   0x4   :  { %s34_s26 = sshll.u32 %s33_s23, 4  ;;  %s47_s29 = sshll.u32 %s592_s3, 4  ;;  %s35_s26 = int_to_ptr.hbm [resolvable:$true] %s34_s26  ;;  %s48_s29 = int_to_ptr.hbm [resolvable:$true] %s47_s29 }
   0x5   :  { %s414_s30 = sshra.s32 %s35_s26, 4  ;;  %s418_s9 = scalar_lea.hbm %s591_s2, 256  ;;  %s415_s30 = int_to_ptr.hbm [resolvable:$true] %s414_s30 }
   0x6   :  { %s416_s6 = scalar_lea.hbm %s415_s30, 256  ;;  %p419_p1 = scmp.lt.s32.totalorder %s415_s30, %s591_s2 }
   0x7   :  { %p417_p0 = scmp.ne.s32.totalorder %s415_s30, %s416_s6  ;;  %p420_p2 = scmp.lt.s32.totalorder %s418_s9, %s416_s6 }
   0x9   :  { %p421_p3 = por %p420_p2, %p419_p1 }
   0xb   :  { %p422_p4 = pnand %p421_p3, %p417_p0 }
   0xd   :  { %425 = shalt.err (!%p422_p4)
}
   0xe   :  { %s493_s12 = smov 128   ;;  %s494_s13 = smov 8  }
   0xf   :  { %42 = dma.hbm_to_vmem [thread:$0]  %s35_s26, 4096, %s37_s25, [#allocation6], %s493_s12, %s493_s12, %s494_s13  }
  0x10   :  { %s495_s3 = smov [#allocation8]  }
  0x11   :  { %s49_s14 = sshll.u32 %s495_s3, 4  ;;  %s50_s14 = int_to_ptr.vmem [resolvable:$true] %s49_s14 }
  0x12   :  { %55 = dma.hbm_to_vmem [thread:$0]  %s48_s29, 2048, %s50_s14, [#allocation9], %s493_s12, %s493_s12, %s494_s13  }
  0x13   :  { %486 = dma.done.wait [#allocation6], 4096  }
  0x14   :  { %487 = vsyncadd [#allocation6], 4294963200 }
  0x15   :  { %488 = dma.done.wait [#allocation9], 2048  }
  0x16   :  { %489 = vsyncadd [#allocation9], 4294965248  ;;  %v169_v0 = vld [vmem:[#allocation5 + $0x78] sm:$0xff]  ;;  %v168_v2 = vld [vmem:[#allocation5 + $0x70] sm:$0xff]  ;;  %s365_s16 = sshll.u32 %s589_s0, 1  ;;  %v94_v22 = vlaneseq  ;;  %v496_v38 = vmov 1.0  }
  0x17   :  { %v185_v1 = vld [vmem:[#allocation5 + $0xf8] sm:$0xff]  ;;  %186 = vmatpush.msra.mxu0 %v169_v0  ;;  %v184_v3 = vld [vmem:[#allocation5 + $0xf0] sm:$0xff]  ;;  %391 = vmatpush.msra.mxu3 %v169_v0  ;;  %v167_v4 = vld [vmem:[#allocation5 + $0x68] sm:$0xff]  ;;  %p75_p5 = scmp.lt.s32.totalorder %s365_s16, 1  ;;  %s497_s20 = smov [#allocation10]  }
  0x18   :  { %221 = vmatpush.msra.mxu1 %v185_v1  ;;  %v183_v5 = vld [vmem:[#allocation5 + $0xe8] sm:$0xff]  ;;  %v166_v6 = vld [vmem:[#allocation5 + $0x60] sm:$0xff]  ;;  %v165_v8 = vld [vmem:[#allocation5 + $0x58] sm:$0xff]  ;;  %v555_v28 = vshrl.u32 %v94_v22, 7  ;;  %s342_s21 = sshll.u32 %s497_s20, 4  ;;  %s343_s21 = int_to_ptr.vmem [resolvable:$true] %s342_s21 }
  0x19   :  { %187 = vmatpush.msra.mxu0 %v168_v2  ;;  %392 = vmatpush.msra.mxu3 %v168_v2  ;;  %v182_v7 = vld [vmem:[#allocation5 + $0xe0] sm:$0xff]  ;;  %v181_v9 = vld [vmem:[#allocation5 + $0xd8] sm:$0xff]  ;;  %v164_v10 = vld [vmem:[#allocation5 + $0x50] sm:$0xff]  ;;  %s596_s16 = smov (!%p75_p5, %s365_s16), 1 }
  0x1a   :  { %222 = vmatpush.msra.mxu1 %v184_v3  ;;  %v180_v11 = vld [vmem:[#allocation5 + $0xd0] sm:$0xff]  ;;  %v163_v12 = vld [vmem:[#allocation5 + $0x48] sm:$0xff]  ;;  %v162_v14 = vld [vmem:[#allocation5 + $0x40] sm:$0xff]  ;;  %s77_s18 = scalar_lea.vmem %s590_s1, %s596_s16  ;;  %v96_v35 = vadd.s32 8, %v555_v28  ;;  %v97_v39 = vadd.s32 16, %v555_v28  ;;  %v98_v43 = vadd.s32 24, %v555_v28 }
  0x1b   :  { %188 = vmatpush.msra.mxu0 %v167_v4  ;;  %393 = vmatpush.msra.mxu3 %v167_v4  ;;  %v179_v13 = vld [vmem:[#allocation5 + $0xc8] sm:$0xff]  ;;  %v178_v15 = vld [vmem:[#allocation5 + $0xc0] sm:$0xff]  ;;  %v161_v16 = vld [vmem:[#allocation5 + $0x38] sm:$0xff]  ;;  %v99_v48 = vadd.s32 32, %v555_v28  ;;  %v100_v53 = vadd.s32 40, %v555_v28 }
  0x1c   :  { %223 = vmatpush.msra.mxu1 %v183_v5  ;;  %v177_v17 = vld [vmem:[#allocation5 + $0xb8] sm:$0xff]  ;;  %v160_v18 = vld [vmem:[#allocation5 + $0x30] sm:$0xff]  ;;  %v159_v20 = vld [vmem:[#allocation5 + $0x28] sm:$0xff] }
  0x1d   :  { %189 = vmatpush.msra.mxu0 %v166_v6  ;;  %394 = vmatpush.msra.mxu3 %v166_v6  ;;  %v176_v19 = vld [vmem:[#allocation5 + $0xb0] sm:$0xff]  ;;  %v175_v21 = vld [vmem:[#allocation5 + $0xa8] sm:$0xff]  ;;  %v158_v23 = vld [vmem:[#allocation5 + $0x20] sm:$0xff] }
  0x1e   :  { %224 = vmatpush.msra.mxu1 %v182_v7  ;;  %v174_v24 = vld [vmem:[#allocation5 + $0xa0] sm:$0xff]  ;;  %v157_v25 = vld [vmem:[#allocation5 + $0x18] sm:$0xff]  ;;  %v156_v29 = vld [vmem:[#allocation5 + $0x10] sm:$0xff] }
  0x1f   :  { %190 = vmatpush.msra.mxu0 %v165_v8  ;;  %395 = vmatpush.msra.mxu3 %v165_v8  ;;  %v173_v26 = vld [vmem:[#allocation5 + $0x98] sm:$0xff]  ;;  %v109_v27 = vld [vmem:[%s77_s18] sm:$0x3]  ;;  %v172_v30 = vld [vmem:[#allocation5 + $0x90] sm:$0xff] }
  0x20   :  { %225 = vmatpush.msra.mxu1 %v181_v9  ;;  %v557_v31 = vperm.slane %v109_v27, 0  ;;  %v559_v32 = vperm.slane %v109_v27, 1  ;;  %v155_v33 = vld [vmem:[#allocation5 + $0x8] sm:$0xff]  ;;  %v154_v36 = vld [vmem:[#allocation5] sm:$0xff]  ;;  %v292_v40 = vld [vmem:[#allocation8 + $0x78] sm:$0xff] }
  0x21   :  { %191 = vmatpush.msra.mxu0 %v164_v10  ;;  %396 = vmatpush.msra.mxu3 %v164_v10  ;;  %v171_v34 = vld [vmem:[#allocation5 + $0x88] sm:$0xff]  ;;  %v170_v37 = vld [vmem:[#allocation5 + $0x80] sm:$0xff]  ;;  %v291_v41 = vld [vmem:[#allocation8 + $0x70] sm:$0xff] }
  0x22   :  { %226 = vmatpush.msra.mxu1 %v180_v11  ;;  %vm112_vm0 = vcmp.eq.s32.totalorder %v555_v28, %v557_v31  ;;  %vm113_vm1 = vcmp.eq.s32.totalorder %v555_v28, %v559_v32  ;;  %vm114_vm2 = vcmp.eq.s32.totalorder %v96_v35, %v557_v31  ;;  %vm115_vm3 = vcmp.eq.s32.totalorder %v96_v35, %v559_v32  ;;  %v290_v42 = vld [vmem:[#allocation8 + $0x68] sm:$0xff]  ;;  %v289_v44 = vld [vmem:[#allocation8 + $0x60] sm:$0xff]  ;;  %v288_v45 = vld [vmem:[#allocation8 + $0x58] sm:$0xff] }
  0x23   :  { %192 = vmatpush.msra.mxu0 %v163_v12  ;;  %397 = vmatpush.msra.mxu3 %v163_v12  ;;  %vm116_vm4 = vcmp.eq.s32.totalorder %v97_v39, %v557_v31  ;;  %vm117_vm5 = vcmp.eq.s32.totalorder %v97_v39, %v559_v32  ;;  %vm118_vm6 = vcmp.eq.s32.totalorder %v98_v43, %v557_v31  ;;  %v287_v46 = vld [vmem:[#allocation8 + $0x50] sm:$0xff]  ;;  %v286_v47 = vld [vmem:[#allocation8 + $0x48] sm:$0xff]  ;;  %v285_v49 = vld [vmem:[#allocation8 + $0x40] sm:$0xff] }
  0x24   :  { %227 = vmatpush.msra.mxu1 %v179_v13  ;;  %297 = vmatpush.msra.mxu2 %v292_v40  ;;  %vm119_vm7 = vcmp.eq.s32.totalorder %v98_v43, %v559_v32  ;;  %v284_v50 = vld [vmem:[#allocation8 + $0x38] sm:$0xff]  ;;  %vm120_vm8 = vcmp.eq.s32.totalorder %v99_v48, %v557_v31  ;;  %v283_v51 = vld [vmem:[#allocation8 + $0x30] sm:$0xff]  ;;  %v282_v52 = vld [vmem:[#allocation8 + $0x28] sm:$0xff]  ;;  %vm121_vm9 = vcmp.eq.s32.totalorder %v99_v48, %v559_v32 }
  0x25   :  { %193 = vmatpush.msra.mxu0 %v162_v14  ;;  %398 = vmatpush.msra.mxu3 %v162_v14  ;;  %v281_v54 = vld [vmem:[#allocation8 + $0x20] sm:$0xff]  ;;  %v280_v55 = vld [vmem:[#allocation8 + $0x18] sm:$0xff]  ;;  %vm122_vm10 = vcmp.eq.s32.totalorder %v100_v53, %v557_v31  ;;  %v279_v56 = vld [vmem:[#allocation8 + $0x10] sm:$0xff]  ;;  %vm123_vm11 = vcmp.eq.s32.totalorder %v100_v53, %v559_v32 }
  0x26   :  { %228 = vmatpush.msra.mxu1 %v178_v15  ;;  %298 = vmatpush.msra.mxu2 %v291_v41  ;;  %v278_v57 = vld [vmem:[#allocation8 + $0x8] sm:$0xff]  ;;  %v277_v58 = vld [vmem:[#allocation8] sm:$0xff] }
  0x27   :  { %194 = vmatpush.msra.mxu0 %v161_v16  ;;  %399 = vmatpush.msra.mxu3 %v161_v16  ;;  %v413_v13 = vld [vmem:[%s593_s4] ss:$0 sm:$0xff]  ;;  %s344_s4 = sshll.u32 %s594_s5, 4  ;;  %s345_s4 = int_to_ptr.hbm [resolvable:$true] %s344_s4 }
  0x28   :  { %229 = vmatpush.msra.mxu1 %v177_v17  ;;  %299 = vmatpush.msra.mxu2 %v290_v42 }
  0x29   :  { %195 = vmatpush.msra.mxu0 %v160_v18  ;;  %400 = vmatpush.msra.mxu3 %v160_v18 }
  0x2a   :  { %230 = vmatpush.msra.mxu1 %v176_v19  ;;  %300 = vmatpush.msra.mxu2 %v289_v44 }
  0x2b   :  { %196 = vmatpush.msra.mxu0 %v159_v20  ;;  %401 = vmatpush.msra.mxu3 %v159_v20 }
  0x2c   :  { %231 = vmatpush.msra.mxu1 %v175_v21  ;;  %301 = vmatpush.msra.mxu2 %v288_v45 }
  0x2d   :  { %197 = vmatpush.msra.mxu0 %v158_v23  ;;  %402 = vmatpush.msra.mxu3 %v158_v23 }
  0x2e   :  { %232 = vmatpush.msra.mxu1 %v174_v24  ;;  %302 = vmatpush.msra.mxu2 %v287_v46 }
  0x2f   :  { %198 = vmatpush.msra.mxu0 %v157_v25  ;;  %403 = vmatpush.msra.mxu3 %v157_v25 }
  0x30   :  { %233 = vmatpush.msra.mxu1 %v173_v26  ;;  %303 = vmatpush.msra.mxu2 %v286_v47 }
  0x31   :  { %199 = vmatpush.msra.mxu0 %v156_v29  ;;  %404 = vmatpush.msra.mxu3 %v156_v29 }
  0x32   :  { %234 = vmatpush.msra.mxu1 %v172_v30  ;;  %304 = vmatpush.msra.mxu2 %v285_v49 }
  0x33   :  { %200 = vmatpush.msra.mxu0 %v155_v33  ;;  %405 = vmatpush.msra.mxu3 %v155_v33 }
  0x34   :  { %235 = vmatpush.msra.mxu1 %v171_v34  ;;  %305 = vmatpush.msra.mxu2 %v284_v50 }
  0x35   :  { %201 = vmatpush.msra.mxu0 %v154_v36  ;;  %406 = vmatpush.msra.mxu3 %v154_v36 }
  0x36   :  { %236 = vmatpush.msra.mxu1 %v170_v37  ;;  %378 = vmatmul.msk.f32.vlgmr.msra.gmra.mxu0 %vm112_vm0, %v496_v38 }
  0x37   :  { %384 = vmatmul.msk.f32.vlgmr.msra.gmra.mxu1 %vm113_vm1, %v496_v38  ;;  %379 = vmatmul.msk.f32.vlgmr.msra.gmra.mxu3 %vm114_vm2, %v496_v38 }
  0x38   :  { %306 = vmatpush.msra.mxu2 %v283_v51 }
  0x3a   :  { %307 = vmatpush.msra.mxu2 %v282_v52 }
  0x3c   :  { %308 = vmatpush.msra.mxu2 %v281_v54 }
  0x3e   :  { %309 = vmatpush.msra.mxu2 %v280_v55 }
  0x3f   :  { %385 = vmatmul.msk.f32.gmra.mxu1 %vm115_vm3, %v496_v38  ;;  %380 = vmatmul.msk.f32.gmra.mxu3 %vm116_vm4, %v496_v38 }
  0x40   :  { %310 = vmatpush.msra.mxu2 %v279_v56 }
  0x42   :  { %311 = vmatpush.msra.mxu2 %v278_v57 }
  0x44   :  { %312 = vmatpush.msra.mxu2 %v277_v58 }
  0x47   :  { %386 = vmatmul.msk.f32.gmra.mxu1 %vm117_vm5, %v496_v38  ;;  %381 = vmatmul.msk.f32.gmra.mxu3 %vm118_vm6, %v496_v38 }
  0x4f   :  { %387 = vmatmul.msk.f32.gmra.mxu1 %vm119_vm7, %v496_v38  ;;  %382 = vmatmul.msk.f32.gmra.mxu3 %vm120_vm8, %v496_v38 }
  0x57   :  { %388 = vmatmul.msk.f32.gmra.mxu1 %vm121_vm9, %v496_v38  ;;  %383 = vmatmul.msk.f32.gmra.mxu3 %vm122_vm10, %v496_v38 }
  0x5f   :  { %389 = vmatmul.msk.f32.gmra.mxu1 %vm123_vm11, %v496_v38 }
  0xb3   :  { %v203_v59 = vpop.f32.mrf.mxu0 }
  0xb4   :  { %v238_v60 = vpop.f32.mrf.mxu1 }
  0xb5   :  { %v239_v61 = vadd.f32 %v238_v60, %v203_v59 }
  0xb7   :  { %313 = vmatmul.f32.vlgmr.msra.gmra.mxu2 %v239_v61 }
  0xba   :  { %v206_v62 = vpop.f32.mrf.mxu3 }
  0xbc   :  { %v241_v63 = vpop.f32.mrf.mxu1 }
  0xbd   :  { %v242_v0 = vadd.f32 %v241_v63, %v206_v62 }
  0xbf   :  { %316 = vmatmul.f32.gmra.mxu2 %v242_v0 }
  0xc2   :  { %v209_v1 = vpop.f32.mrf.mxu3 }
  0xc4   :  { %v244_v2 = vpop.f32.mrf.mxu1 }
  0xc5   :  { %v245_v3 = vadd.f32 %v244_v2, %v209_v1 }
  0xc7   :  { %319 = vmatmul.f32.gmra.mxu2 %v245_v3 }
  0xca   :  { %v212_v4 = vpop.f32.mrf.mxu3 }
  0xcc   :  { %v247_v5 = vpop.f32.mrf.mxu1 }
  0xcd   :  { %v248_v6 = vadd.f32 %v247_v5, %v212_v4 }
  0xcf   :  { %322 = vmatmul.f32.gmra.mxu2 %v248_v6 }
  0xd2   :  { %v215_v7 = vpop.f32.mrf.mxu3 }
  0xd4   :  { %v250_v8 = vpop.f32.mrf.mxu1 }
  0xd5   :  { %v251_v9 = vadd.f32 %v250_v8, %v215_v7 }
  0xd7   :  { %325 = vmatmul.f32.gmra.mxu2 %v251_v9 }
  0xda   :  { %v218_v10 = vpop.f32.mrf.mxu3 }
  0xdc   :  { %v253_v11 = vpop.f32.mrf.mxu1 }
  0xdd   :  { %v254_v12 = vadd.f32 %v253_v11, %v218_v10 }
  0xdf   :  { %328 = vmatmul.f32.gmra.mxu2 %v254_v12 }
 0x13a   :  { %v314_v14 = vpop.f32.mrf.mxu2 }
 0x13b   :  { %v315_v15 = vadd.f32 %v413_v13, %v314_v14 }
 0x13d   :  { %332 = vst [vmem:[#allocation10] sm:$0xff] %v315_v15 }
 0x142   :  { %v317_v16 = vpop.f32.mrf.mxu2 }
 0x143   :  { %v318_v17 = vadd.f32 %v413_v13, %v317_v16 }
 0x145   :  { %333 = vst [vmem:[#allocation10 + $0x8] sm:$0xff] %v318_v17 }
 0x14a   :  { %v320_v18 = vpop.f32.mrf.mxu2 }
 0x14b   :  { %v321_v19 = vadd.f32 %v413_v13, %v320_v18 }
 0x14d   :  { %334 = vst [vmem:[#allocation10 + $0x10] sm:$0xff] %v321_v19 }
 0x152   :  { %v323_v20 = vpop.f32.mrf.mxu2 }
 0x153   :  { %v324_v21 = vadd.f32 %v413_v13, %v323_v20 }
 0x155   :  { %335 = vst [vmem:[#allocation10 + $0x18] sm:$0xff] %v324_v21 }
 0x15a   :  { %v326_v22 = vpop.f32.mrf.mxu2 }
 0x15b   :  { %v327_v23 = vadd.f32 %v413_v13, %v326_v22 }
 0x15d   :  { %336 = vst [vmem:[#allocation10 + $0x20] sm:$0xff] %v327_v23 }
 0x162   :  { %v329_v24 = vpop.f32.mrf.mxu2 }
 0x163   :  { %v330_v25 = vadd.f32 %v413_v13, %v329_v24 }
 0x165   :  { %337 = vst [vmem:[#allocation10 + $0x28] sm:$0xff] %v330_v25 }
 0x166   :  { %350 = dma.vmem_to_hbm [thread:$0]  %s343_s21, 768, %s345_s4, [#allocation7], %s493_s12, %s493_s12, %s494_s13  }
 0x167   :  { %490 = dma.done.wait [#allocation7], 768  }
 0x168   :  { %491 = vsyncadd [#allocation7], 4294966528 }
 0x169   :  { %355 = vsyncpa [#allocation6], 1 }
 0x16a   :  { %356 = vsyncpa [#allocation9], 1 }
 0x16b   :  { %357 = vsyncpa [#allocation7], 1 }

</bundles_post_ra>
